<compile_context>
chip_gen: v7x
topology: tpu7x:2x2x1
jax: 0.10.0
libtpu: 0.0.40
codegen_flags: <defaults>
</compile_context>

<pallas_src>
import functools
from itertools import combinations

import numpy as np
import jax
import jax.numpy as jnp
from jax import lax
from jax.experimental import pallas as pl
from jax.experimental.pallas import tpu as pltpu

MARGIN = 0.2
EPS = 1e-8                    # nn.CosineSimilarity default eps
LANES = 128
MAX_TILE_ROWS = 4096          # 4096x128 f32 x 1 stream x 2 buffers = 4 MiB VMEM
SIM_SINGLE_BLOCK_MAX_N = 512  # below this: one (N,N) block; above: 256x512 S-tiles
SIM_BLOCK_M = 256
SIM_BLOCK_N = 512


# ----------------------------- triplet mining (host glue) -----------------------------
def get_all_triplets(labels: np.ndarray) -> np.ndarray:
    """Same semantics as CosineTripletLoss.get_all_triplets (numpy/itertools)."""
    triplets = []
    for label in set(labels.tolist()):
        label_mask = labels == label
        label_indices = np.where(label_mask)[0]
        if len(label_indices) < 2:
            continue
        negative_indices = np.where(np.logical_not(label_mask))[0]
        anchor_positives = list(combinations(label_indices, 2))
        triplets += [
            [ap[0], ap[1], neg] for ap in anchor_positives for neg in negative_indices
        ]
    if len(triplets) == 0:
        return np.zeros((0, 3), dtype=np.int64)
    return np.array(triplets, dtype=np.int64)


# ------------------------- Kernel A: cosine similarity matrix --------------------------
def _cosine_sim_kernel(er_ref, ec_ref, s_ref, *, eps):
    er = er_ref[...].astype(jnp.float32)
    ec = ec_ref[...].astype(jnp.float32)
    # x / max(||x||, eps)  ==  x * rsqrt(max(||x||^2, eps^2)); rsqrt goes to the EUP.
    # Note: PyTorch clamps the *product* of norms; results differ only for
    # near-zero-norm embeddings.
    er_n = er * lax.rsqrt(jnp.maximum(jnp.sum(er * er, axis=-1, keepdims=True), eps * eps))
    ec_n = ec * lax.rsqrt(jnp.maximum(jnp.sum(ec * ec, axis=-1, keepdims=True), eps * eps))
    # S-tile = Er_n @ Ec_n^T on the MXU (contract D of both operands, no explicit T).
    # TODO(synk): cast er_n/ec_n to bf16 (keep f32 accumulation) for ~3x MXU throughput
    # once the ~1e-3 cosine error near the hinge is validated against the reference.
    s_ref[...] = lax.dot_general(
        er_n, ec_n, (((1,), (1,)), ((), ())), preferred_element_type=jnp.float32
    )


def _cosine_sim_matrix(emb):
    N, D = emb.shape
    if N <= SIM_SINGLE_BLOCK_MAX_N:
        bm = bn = N
        n_pad = N
    else:
        bm, bn = SIM_BLOCK_M, SIM_BLOCK_N
        n_pad = pl.cdiv(N, SIM_BLOCK_N) * SIM_BLOCK_N  # multiple of both 256 and 512
        if n_pad != N:
            # Zero rows normalize to zero vectors -> zero cosines; never gathered.
            emb = jnp.pad(emb, ((0, n_pad - N), (0, 0)))

    # Raise scoped VMEM only when the double-buffered blocks would exceed the
    # smallest default (v5e: 16 MiB); cap at v7x's 64 MiB physical VMEM.
    need = 2 * 4 * (bm * D + bn * D + bm * bn)
    vmem_limit = int(min(need * 2, 64 << 20)) if need > (12 << 20) else None

    return pl.pallas_call(
        functools.partial(_cosine_sim_kernel, eps=EPS),
        out_shape=jax.ShapeDtypeStruct((n_pad, n_pad), jnp.float32),
        grid=(n_pad // bm, n_pad // bn),
        in_specs=[pl.BlockSpec((bm, D), lambda i, j: (i, 0)),
                  pl.BlockSpec((bn, D), lambda i, j: (j, 0))],
        out_specs=pl.BlockSpec((bm, bn), lambda i, j: (i, j)),
        compiler_params=pltpu.CompilerParams(
            dimension_semantics=("parallel", "parallel"),
            vmem_limit_bytes=vmem_limit),
    )(emb, emb)


# ------------------- Kernel B: relu(diff + margin) lane-dense partials ------------------
def _hinge_reduce_kernel(d_ref, out_ref, *, margin, tile_rows):
    # Padded lanes carry diff = -margin, so relu(-margin + margin) = 0: no mask needed.
    x = jnp.maximum(d_ref[...] + margin, 0.0)                      # (tile_rows, 128)
    # Sublane-block reduce to a lane-dense (8, 128) slab: pure VPU adds over the major
    # axis and an unmasked full-lane store (no vst.msk, no XLU lane reduce).
    out_ref[...] = jnp.sum(x.reshape(tile_rows // 8, 8, LANES), axis=0)


def _hinge_partials(diff2d, margin, tile_rows):
    rows_pad, _ = diff2d.shape
    num_blocks = rows_pad // tile_rows
    return pl.pallas_call(
        functools.partial(_hinge_reduce_kernel, margin=margin, tile_rows=tile_rows),
        out_shape=jax.ShapeDtypeStruct((num_blocks * 8, LANES), jnp.float32),
        grid=(num_blocks,),
        in_specs=[pl.BlockSpec((tile_rows, LANES), lambda i: (i, 0))],
        out_specs=pl.BlockSpec((8, LANES), lambda i: (i, 0)),
        compiler_params=pltpu.CompilerParams(dimension_semantics=("parallel",)),
    )(diff2d)


# ------------------------------------- wrapper -----------------------------------------
def cosine_triplet_loss(embeddings, labels, max_score=None, margin=MARGIN,
                        max_tile_rows=MAX_TILE_ROWS):
    """Forward of CosineTripletLoss: returns (mean loss, number of triplets)."""
    del max_score  # unused by the PyTorch forward as well
    triplets = get_all_triplets(np.asarray(labels))
    if triplets.shape[0] == 0:
        return (0, 0)  # mirrors the PyTorch `except: return (0, 0)` path

    T = int(triplets.shape[0])
    emb = jnp.asarray(embeddings, dtype=jnp.float32)

    # One normalized E @ E^T on the MXU; all T cosines are scalar lookups into it.
    sim = _cosine_sim_matrix(emb)
    n_pad = sim.shape[0]
    sim_flat = sim.reshape(-1)

    a_idx = jnp.asarray(triplets[:, 0], dtype=jnp.int32)
    p_idx = jnp.asarray(triplets[:, 1], dtype=jnp.int32)
    n_idx = jnp.asarray(triplets[:, 2], dtype=jnp.int32)
    ap_cos = jnp.take(sim_flat, a_idx * n_pad + p_idx)   # [T] scalars, not [T, D] rows
    an_cos = jnp.take(sim_flat, a_idx * n_pad + n_idx)
    # Single stream into Kernel B; XLA fuses the subtract into the gather epilogue.
    diff = an_cos - ap_cos
    # TODO(synk): eliminate the O(T) XLA scalar gather entirely by walking
    # (anchor, positive, negative-block) over sim-matrix rows inside a Pallas kernel
    # with PrefetchScalarGridSpec (per-label offsets); dominant win when T >> N^2.

    # Lane-dense packing: [T] -> [rows_pad, 128] so every vreg lane does work.
    rows_total = max(1, pl.cdiv(T, LANES))
    rows_aligned = pl.cdiv(rows_total, 8) * 8
    tile_rows = min(max_tile_rows, rows_aligned)
    num_blocks = pl.cdiv(rows_aligned, tile_rows)
    rows_pad = num_blocks * tile_rows
    pad = rows_pad * LANES - T

    diff2d = jnp.pad(diff, (0, pad), constant_values=-margin).reshape(rows_pad, LANES)

    partials = _hinge_partials(diff2d, margin, tile_rows)
    loss = jnp.sum(partials) / jnp.float32(T)
    return loss, T


# --------------------------------------- main -------------------------------------------
if __name__ == "__main__":
    key = jax.random.PRNGKey(0)
    N, D = 8, 32
    embeddings = jax.random.normal(key, (N, D), dtype=jnp.float32)
    labels = np.array([0, 0, 1, 1, 2, 2, 3, 3], dtype=np.int64)
    max_score = 1.0  # unused (matches PyTorch forward signature)

    loss, n_triplets = cosine_triplet_loss(embeddings, labels, max_score)
    loss = jax.block_until_ready(loss)

    # Pure-numpy reference (same math as nn.CosineSimilarity + F.relu + mean).
    trips = get_all_triplets(labels)
    e = np.asarray(embeddings, dtype=np.float32)
    a_, p_, n_ = e[trips[:, 0]], e[trips[:, 1]], e[trips[:, 2]]

    def _cos(x, y):
        num = np.sum(x * y, axis=1)
        den = np.maximum(np.linalg.norm(x, axis=1) * np.linalg.norm(y, axis=1), EPS)
        return num / den

    ref = np.mean(np.maximum(_cos(a_, n_) - _cos(a_, p_) + MARGIN, 0.0))
    # Tolerance leaves headroom for MXU f32 accumulation of the sim-matrix matmul.
    np.testing.assert_allclose(float(loss), ref, rtol=1e-3, atol=1e-3)
    assert n_triplets == trips.shape[0]

    print("KERNEL_OK")
</pallas_src>

<mosaic_0001>
module attributes {stable_mosaic.version = 11 : i64} {
  func.func @_cosine_sim_kernel(%arg0: i32, %arg1: i32, %arg2: memref<8x32xf32, #tpu.memory_space<vmem>>, %arg3: memref<8x32xf32, #tpu.memory_space<vmem>>, %arg4: memref<8x8xf32, #tpu.memory_space<vmem>>) attributes {dimension_semantics = [#tpu.dimension_semantics<parallel>, #tpu.dimension_semantics<parallel>], iteration_bounds = array<i64: 1, 1>, scalar_prefetch = 0 : i64, scratch_operands = 0 : i64, tpu.core_type = #tpu.core_type<tc>, window_params = [{transform_indices = @transform_0, window_bounds = array<i64: 8, 32>}, {transform_indices = @transform_1, window_bounds = array<i64: 8, 32>}, {transform_indices = @transform_2, window_bounds = array<i64: 8, 8>}]} {
    %c0 = arith.constant 0 : index
    %c0_0 = arith.constant 0 : index
    %0 = vector.load %arg2[%c0, %c0_0] : memref<8x32xf32, #tpu.memory_space<vmem>>, vector<8x32xf32>
    %c0_1 = arith.constant 0 : index
    %c0_2 = arith.constant 0 : index
    %1 = vector.load %arg3[%c0_1, %c0_2] : memref<8x32xf32, #tpu.memory_space<vmem>>, vector<8x32xf32>
    %2 = arith.mulf %0, %0 : vector<8x32xf32>
    %cst = arith.constant dense<0.000000e+00> : vector<8xf32>
    %3 = vector.multi_reduction <add>, %2, %cst [1] : vector<8x32xf32> to vector<8xf32>
    %4 = vector.shape_cast %3 : vector<8xf32> to vector<8x1xf32>
    %cst_3 = arith.constant 1.000000e-16 : f32
    %5 = vector.broadcast %cst_3 : f32 to vector<8x1xf32>
    %6 = arith.maximumf %4, %5 : vector<8x1xf32>
    %7 = math.rsqrt %6 : vector<8x1xf32>
    %8 = vector.broadcast %7 : vector<8x1xf32> to vector<8x32xf32>
    %9 = arith.mulf %0, %8 : vector<8x32xf32>
    %10 = arith.mulf %1, %1 : vector<8x32xf32>
    %cst_4 = arith.constant dense<0.000000e+00> : vector<8xf32>
    %11 = vector.multi_reduction <add>, %10, %cst_4 [1] : vector<8x32xf32> to vector<8xf32>
    %12 = vector.shape_cast %11 : vector<8xf32> to vector<8x1xf32>
    %cst_5 = arith.constant 1.000000e-16 : f32
    %13 = vector.broadcast %cst_5 : f32 to vector<8x1xf32>
    %14 = arith.maximumf %12, %13 : vector<8x1xf32>
    %15 = math.rsqrt %14 : vector<8x1xf32>
    %16 = vector.broadcast %15 : vector<8x1xf32> to vector<8x32xf32>
    %17 = arith.mulf %1, %16 : vector<8x32xf32>
    %cst_6 = arith.constant dense<0.000000e+00> : vector<8x8xf32>
    %18 = tpu.matmul %9, %17, %cst_6 {dimension_numbers = #tpu.dot_dimension_numbers<[1], [1], [0], [0], [0, 0, 1, 0], [], []>} : vector<8x32xf32>, vector<8x32xf32>, vector<8x8xf32> -> vector<8x8xf32>
    %c0_7 = arith.constant 0 : index
    %c0_8 = arith.constant 0 : index
    %19 = vector.load %arg4[%c0_7, %c0_8] : memref<8x8xf32, #tpu.memory_space<vmem>>, vector<8x8xf32>
    tpu.vector_store %arg4[%c0_7, %c0_8], %18 {strides = array<i32>} : memref<8x8xf32, #tpu.memory_space<vmem>>, vector<8x8xf32>,
    return
  }
  func.func @transform_0(%arg0: i32, %arg1: i32) -> (i32, i32) {
    %c0_i32 = arith.constant 0 : i32
    %c0_i32_0 = arith.constant 0 : i32
    return %arg0, %c0_i32 : i32, i32
  }
  func.func @transform_1(%arg0: i32, %arg1: i32) -> (i32, i32) {
    %c0_i32 = arith.constant 0 : i32
    %c0_i32_0 = arith.constant 0 : i32
    return %arg1, %c0_i32 : i32, i32
  }
  func.func @transform_2(%arg0: i32, %arg1: i32) -> (i32, i32) {
    %c0_i32 = arith.constant 0 : i32
    return %arg0, %arg1 : i32, i32
  }
}

</mosaic_0001>

<bundles_post_ra>
// kernel: tpu_custom_call.1
= control target key start
LH: loop header
LB: loop body
LE: loop exit
PB: predicated region body
PF: predicated region fallthrough
CT: control target
= control target key end

     0   :  { %7 = vsyncpa [#allocation3], 0  ;;  %s297_s0 = inlined_call_operand.hbm [shape: f32[8,32], index: 0, kind: input, shape index: {}]   ;;  %s298_s1 = inlined_call_operand.hbm [shape: f32[8,32], index: 1, kind: input, shape index: {}]   ;;  %s299_s2 = inlined_call_operand.hbm [shape: f32[8,8], index: 2, kind: output, shape index: {}]  }
   0x1   :  { %8 = vsyncpa [#allocation6], 0 }
   0x2   :  { %9 = vsyncpa [#allocation4], 0  ;;  %s237_s9 = smov [#allocation2]   ;;  %s238_s11 = smov [#allocation5]  }
   0x3   :  { %s16_s10 = sshll.u32 %s237_s9, 4  ;;  %s26_s12 = sshll.u32 %s238_s11, 4  ;;  %s17_s10 = int_to_ptr.vmem [resolvable:$true] %s16_s10  ;;  %s27_s12 = int_to_ptr.vmem [resolvable:$true] %s26_s12 }
   0x4   :  { %s165_s15 = scalar_lea.hbm %s297_s0, 128 }
   0x5   :  { %p166_p0 = scmp.ne.s32.totalorder %s297_s0, %s165_s15  ;;  %p169_p1 = scmp.lt.u32.totalorder %s165_s15, %s297_s0 }
   0x7   :  { %p171_p2 = pnand %p169_p1, %p166_p0 }
   0x9   :  { %174 = shalt.err (!%p171_p2)
}
   0xa   :  { %s175_s20 = scalar_lea.vmem %s17_s10, 128  ;;  %p180_p4 = scmp.lt.s32.totalorder %s17_s10, %s17_s10 }
   0xb   :  { %p176_p3 = scmp.ne.s32.totalorder %s17_s10, %s175_s20  ;;  %p181_p5 = scmp.lt.s32.totalorder %s175_s20, %s175_s20 }
   0xd   :  { %p182_p6 = por %p181_p5, %p180_p4 }
   0xf   :  { %p183_p7 = pnand %p182_p6, %p176_p3 }
  0x11   :  { %186 = shalt.err (!%p183_p7)
}
  0x12   :  { %19 = dma.hbm_to_vmem [thread:$0]  %s297_s0, 128, %s17_s10, [#allocation3]  }
  0x13   :  { %s187_s25 = scalar_lea.hbm %s298_s1, 128 }
  0x14   :  { %p188_p8 = scmp.ne.s32.totalorder %s298_s1, %s187_s25  ;;  %p191_p9 = scmp.lt.u32.totalorder %s187_s25, %s298_s1 }
  0x16   :  { %p193_p10 = pnand %p191_p9, %p188_p8 }
  0x18   :  { %196 = shalt.err (!%p193_p10)
}
  0x19   :  { %s197_s30 = scalar_lea.vmem %s27_s12, 128  ;;  %p202_p12 = scmp.lt.s32.totalorder %s27_s12, %s27_s12 }
  0x1a   :  { %p198_p11 = scmp.ne.s32.totalorder %s27_s12, %s197_s30  ;;  %p203_p13 = scmp.lt.s32.totalorder %s197_s30, %s197_s30 }
  0x1c   :  { %p204_p0 = por %p203_p13, %p202_p12 }
  0x1e   :  { %p205_p1 = pnand %p204_p0, %p198_p11 }
  0x20   :  { %208 = shalt.err (!%p205_p1)
}
  0x21   :  { %29 = dma.hbm_to_vmem [thread:$0]  %s298_s1, 128, %s27_s12, [#allocation6]  }
  0x22   :  { %231 = dma.done.wait [#allocation3], 128  }
  0x23   :  { %232 = vsyncadd [#allocation3], 4294967168 }
  0x24   :  { %233 = dma.done.wait [#allocation6], 128  }
  0x25   :  { %234 = vsyncadd [#allocation6], 4294967168  ;;  %v37_v0 = vld [vmem:[#allocation5] sm:$0xff]  ;;  %vm39_vm0 = vcmask 261120   ;;  %v36_v1 = vld [vmem:[#allocation2] sm:$0xff]  ;;  %v239_v6 = vmov 0.0  }
  0x26   :  { %v46_v2 = vmul.f32 %v37_v0, %v37_v0  ;;  %v38_v3 = vmul.f32 %v36_v1, %v36_v1  ;;  %151 = vmatprep.subr.mxu0 %v239_v6  ;;  %vm240_vm1 = vmmov 0   ;;  %s241_s1 = smov [#allocation7]   ;;  %vm129_vm2 = vcmask 64512  }
  0x27   :  { %153 = vmatprep.mubr.msk.f32.mxu0 %vm240_vm1, %v239_v6  ;;  %s137_s4 = sshll.u32 %s241_s1, 4  ;;  %s138_s4 = int_to_ptr.vmem [resolvable:$true] %s137_s4 }
  0x28   :  { %v47_v4 = vsel %vm39_vm0, %v46_v2, 0.0  ;;  %v40_v5 = vsel %vm39_vm0, %v38_v3, 0.0  ;;  %s209_s5 = scalar_lea.vmem %s138_s4, 128  ;;  %p214_p3 = scmp.lt.s32.totalorder %s138_s4, %s138_s4 }
  0x29   :  { %48 = vadd.xlane.f32.xlu0 %v47_v4  ;;  %p210_p2 = scmp.ne.s32.totalorder %s138_s4, %s209_s5  ;;  %p215_p4 = scmp.lt.s32.totalorder %s209_s5, %s209_s5 }
  0x2b   :  { %p216_p5 = por %p215_p4, %p214_p3 }
  0x2d   :  { %41 = vadd.xlane.f32.xlu0 %v40_v5  ;;  %p217_p6 = pnand %p216_p5, %p210_p2 }
  0xb6   :  { %v49_v7 = vpop.xlane.xlu0 %48 }
  0xb7   :  { %v50_v8 = vmax.f32 %v49_v7, 1e-16 }
  0xb9   :  { %161 = vrsqrt.f32 %v50_v8 }
  0xba   :  { %v42_v9 = vpop.xlane.xlu0 %41 }
  0xbb   :  { %v43_v10 = vmax.f32 %v42_v9, 1e-16 }
  0xbd   :  { %163 = vrsqrt.f32 %v43_v10 }
  0xc3   :  { %v162_v11 = vpop.eup %161 }
  0xc4   :  { %v52_v12 = vmul.f32 %v162_v11, %v37_v0 }
  0xc6   :  { %152 = vmatpush3.xpose.msk.msra.mxu0 %vm39_vm0, %v52_v12 }
  0xc7   :  { %v164_v13 = vpop.eup %163 }
  0xc8   :  { %v45_v14 = vmul.f32 %v164_v13, %v36_v1 }
  0xca   :  { %154 = vmatmul.mubr.msk.f32.vlgmr.msra.gmra.mrb[0].mxu0 %vm39_vm0, %v45_v14 }
 0x19d   :  { %v125_v15 = vpop.f32.mrb[0].mxu0 }
 0x19e   :  { %v155_v16 = vpop.f32.mrb[1].mxu0  ;;  %130 = vst.msk [vmem:[#allocation7] sm:$0xff] %vm129_vm2, %v125_v15 }
 0x19f   :  { %220 = shalt.err (!%p217_p6)
}
 0x1a0   :  { %s221_s8 = scalar_lea.hbm %s299_s2, 128 }
 0x1a1   :  { %p222_p7 = scmp.ne.s32.totalorder %s299_s2, %s221_s8  ;;  %p225_p8 = scmp.lt.u32.totalorder %s221_s8, %s299_s2 }
 0x1a3   :  { %p227_p9 = pnand %p225_p8, %p222_p7 }
 0x1a5   :  { %230 = shalt.err (!%p227_p9)
}
 0x1a6   :  { %140 = dma.vmem_to_hbm [thread:$0]  %s138_s4, 128, %s299_s2, [#allocation4]  }
 0x1a7   :  { %235 = dma.done.wait [#allocation4], 128  }
 0x1a8   :  { %236 = vsyncadd [#allocation4], 4294967168 }
 0x1a9   :  { %144 = vsyncpa [#allocation3], 1 }
 0x1aa   :  { %145 = vsyncpa [#allocation6], 1 }
 0x1ab   :  { %146 = vsyncpa [#allocation4], 1 }

</bundles_post_ra>
